<compile_context>
chip_gen: v7x
topology: tpu7x:2x2x1
jax: 0.10.0
libtpu: 0.0.40
codegen_flags: <defaults>
</compile_context>

<pallas_src>
import functools

import jax
import jax.numpy as jnp
from jax.experimental import pallas as pl
from jax.experimental.pallas import tpu as pltpu

_NEG_LARGE = -1e30  # masks padded class columns out of the log_softmax


def _round_up(x, m):
    return (x + m - 1) // m * m


def _classifier_head_kernel(x_ref, w_ref, b_ref, o_ref):
    # x_ref: (TM, D)   w_ref: (D, Cp)   b_ref: (1, Cp)   o_ref: (TM, Cp)
    # MXU matmul with f32 accumulation; operands stay in their native dtype.
    logits = jnp.dot(x_ref[...], w_ref[...], preferred_element_type=jnp.float32)
    logits = logits + b_ref[...].astype(jnp.float32)

    # Numerically-stable log_softmax over the (padded) class dim.
    m = jnp.max(logits, axis=-1, keepdims=True)
    shifted = logits - m
    lse = jnp.log(jnp.sum(jnp.exp(shifted), axis=-1, keepdims=True))
    o_ref[...] = (shifted - lse).astype(o_ref.dtype)


@functools.partial(jax.jit, static_argnames=("block_rows",))
def classifier_head(x, weight, bias, *, block_rows=256):
    """x: (B, S, D); weight: (D, C); bias: (C,). Returns (B, S, C) log-probs."""
    B, S, D = x.shape
    C = weight.shape[1]
    N = B * S

    # Row tile: multiple of 8 sublanes, capped at block_rows.
    tm = min(block_rows, _round_up(N, 8))
    n_pad = _round_up(N, tm)
    # Class dim padded to a lane-dense multiple of 128.
    c_pad = _round_up(C, 128)

    x2d = x.reshape(N, D)
    if n_pad != N:
        x2d = jnp.pad(x2d, ((0, n_pad - N), (0, 0)))
    w_p = jnp.pad(weight, ((0, 0), (0, c_pad - C)))
    b_p = jnp.pad(
        bias.reshape(1, C), ((0, 0), (0, c_pad - C)), constant_values=_NEG_LARGE
    )

    grid = (n_pad // tm,)

    x_bytes = jnp.dtype(x.dtype).itemsize
    w_bytes = jnp.dtype(weight.dtype).itemsize
    bytes_accessed = int(
        n_pad * D * x_bytes          # x stream
        + D * c_pad * w_bytes        # resident weight (read once)
        + c_pad * w_bytes            # bias
        + n_pad * c_pad * x_bytes    # output stream
    )
    cost = pl.CostEstimate(
        flops=2 * n_pad * D * c_pad + 5 * n_pad * c_pad,
        transcendentals=n_pad * c_pad,
        bytes_accessed=bytes_accessed,
    )

    out = pl.pallas_call(
        _classifier_head_kernel,
        out_shape=jax.ShapeDtypeStruct((n_pad, c_pad), x.dtype),
        grid_spec=pltpu.PrefetchScalarGridSpec(
            num_scalar_prefetch=0,
            grid=grid,
            in_specs=[
                pl.BlockSpec((tm, D), lambda i: (i, 0)),      # row tile of x
                pl.BlockSpec((D, c_pad), lambda i: (0, 0)),   # weight: resident
                pl.BlockSpec((1, c_pad), lambda i: (0, 0)),   # bias: resident
            ],
            out_specs=pl.BlockSpec((tm, c_pad), lambda i: (i, 0)),
        ),
        compiler_params=pltpu.CompilerParams(
            dimension_semantics=("parallel",),
            vmem_limit_bytes=48 * 1024 * 1024,
        ),
        cost_estimate=cost,
    )(x2d, w_p, b_p)

    return out[:N, :C].reshape(B, S, C)


if __name__ == "__main__":
    key = jax.random.PRNGKey(0)
    k_x, k_w, k_b = jax.random.split(key, 3)

    batch, seq, d_model, num_classes = 2, 8, 32, 10

    x = jax.random.normal(k_x, (batch, seq, d_model), dtype=jnp.float32)
    # Deterministic parameter init mimicking nn.Linear's uniform(-1/sqrt(D), 1/sqrt(D)).
    bound = 1.0 / (d_model ** 0.5)
    weight = jax.random.uniform(
        k_w, (d_model, num_classes), minval=-bound, maxval=bound, dtype=jnp.float32
    )
    bias = jax.random.uniform(
        k_b, (num_classes,), minval=-bound, maxval=bound, dtype=jnp.float32
    )

    out = classifier_head(x, weight, bias)
    jax.block_until_ready(out)

    # Reference check in plain JAX.
    ref = jax.nn.log_softmax(x @ weight + bias, axis=-1)
    assert out.shape == (batch, seq, num_classes)
    assert jnp.allclose(out, ref, atol=1e-5, rtol=1e-5), float(
        jnp.max(jnp.abs(out - ref))
    )

    print("KERNEL_OK")
</pallas_src>

<mosaic_0001>
module attributes {stable_mosaic.version = 11 : i64} {
  func.func @_classifier_head_kernel(%arg0: i32, %arg1: memref<16x32xf32, #tpu.memory_space<vmem>>, %arg2: memref<32x128xf32, #tpu.memory_space<vmem>>, %arg3: memref<1x128xf32, #tpu.memory_space<vmem>>, %arg4: memref<16x128xf32, #tpu.memory_space<vmem>>) attributes {dimension_semantics = [#tpu.dimension_semantics<parallel>], iteration_bounds = array<i64: 1>, scalar_prefetch = 0 : i64, scratch_operands = 0 : i64, tpu.core_type = #tpu.core_type<tc>, window_params = [{transform_indices = @transform_0, window_bounds = array<i64: 16, 32>}, {pipeline_mode = #tpu.pipeline_mode<synchronous>, transform_indices = @transform_1, window_bounds = array<i64: 32, 128>}, {pipeline_mode = #tpu.pipeline_mode<synchronous>, transform_indices = @transform_2, window_bounds = array<i64: 1, 128>}, {transform_indices = @transform_3, window_bounds = array<i64: 16, 128>}]} {
    %c0 = arith.constant 0 : index
    %c0_0 = arith.constant 0 : index
    %0 = vector.load %arg1[%c0, %c0_0] : memref<16x32xf32, #tpu.memory_space<vmem>>, vector<16x32xf32>
    %c0_1 = arith.constant 0 : index
    %c0_2 = arith.constant 0 : index
    %1 = vector.load %arg2[%c0_1, %c0_2] : memref<32x128xf32, #tpu.memory_space<vmem>>, vector<32x128xf32>
    %cst = arith.constant dense<0.000000e+00> : vector<16x128xf32>
    %2 = tpu.matmul %0, %1, %cst {dimension_numbers = #tpu.dot_dimension_numbers<[1], [0], [0], [1], [0, 0, 1, 1], [], []>} : vector<16x32xf32>, vector<32x128xf32>, vector<16x128xf32> -> vector<16x128xf32>
    %c0_3 = arith.constant 0 : index
    %c0_4 = arith.constant 0 : index
    %3 = vector.load %arg3[%c0_3, %c0_4] : memref<1x128xf32, #tpu.memory_space<vmem>>, vector<1x128xf32>
    %4 = vector.broadcast %3 : vector<1x128xf32> to vector<16x128xf32>
    %5 = arith.addf %2, %4 : vector<16x128xf32>
    %cst_5 = arith.constant dense<0xFF800000> : vector<16xf32>
    %6 = vector.multi_reduction <maximumf>, %5, %cst_5 [1] : vector<16x128xf32> to vector<16xf32>
    %7 = vector.shape_cast %6 : vector<16xf32> to vector<16x1xf32>
    %8 = vector.broadcast %7 : vector<16x1xf32> to vector<16x128xf32>
    %9 = arith.subf %5, %8 : vector<16x128xf32>
    %10 = math.exp %9 : vector<16x128xf32>
    %cst_6 = arith.constant dense<0.000000e+00> : vector<16xf32>
    %11 = vector.multi_reduction <add>, %10, %cst_6 [1] : vector<16x128xf32> to vector<16xf32>
    %12 = vector.shape_cast %11 : vector<16xf32> to vector<16x1xf32>
    %13 = math.log %12 : vector<16x1xf32>
    %14 = vector.broadcast %13 : vector<16x1xf32> to vector<16x128xf32>
    %15 = arith.subf %9, %14 : vector<16x128xf32>
    %c0_7 = arith.constant 0 : index
    %c0_8 = arith.constant 0 : index
    %16 = vector.load %arg4[%c0_7, %c0_8] : memref<16x128xf32, #tpu.memory_space<vmem>>, vector<16x128xf32>
    tpu.vector_store %arg4[%c0_7, %c0_8], %15 {strides = array<i32>} : memref<16x128xf32, #tpu.memory_space<vmem>>, vector<16x128xf32>,
    return
  }
  func.func @transform_0(%arg0: i32) -> (i32, i32) {
    %c0_i32 = arith.constant 0 : i32
    %c0_i32_0 = arith.constant 0 : i32
    return %arg0, %c0_i32 : i32, i32
  }
  func.func @transform_1(%arg0: i32) -> (i32, i32) {
    %c0_i32 = arith.constant 0 : i32
    %c0_i32_0 = arith.constant 0 : i32
    %c0_i32_1 = arith.constant 0 : i32
    return %c0_i32, %c0_i32_0 : i32, i32
  }
  func.func @transform_2(%arg0: i32) -> (i32, i32) {
    %c0_i32 = arith.constant 0 : i32
    %c0_i32_0 = arith.constant 0 : i32
    %c0_i32_1 = arith.constant 0 : i32
    return %c0_i32, %c0_i32_0 : i32, i32
  }
  func.func @transform_3(%arg0: i32) -> (i32, i32) {
    %c0_i32 = arith.constant 0 : i32
    %c0_i32_0 = arith.constant 0 : i32
    return %arg0, %c0_i32 : i32, i32
  }
}

</mosaic_0001>

<bundles_post_ra>
// kernel: classifier_head.1
= control target key start
LH: loop header
LB: loop body
LE: loop exit
PB: predicated region body
PF: predicated region fallthrough
CT: control target
= control target key end

     0   :  { %vm27_vm0 = vcmask 261120   ;;  %s218_s1 = inlined_call_operand.vmem [shape: f32[32,128], index: 1, kind: input, shape index: {}]   ;;  %s219_s0 = inlined_call_operand.vmem [shape: f32[16,32], index: 0, kind: input, shape index: {}]   ;;  %s220_s2 = inlined_call_operand.vmem [shape: f32[1,128], index: 2, kind: input, shape index: {}]   ;;  %s221_s3 = inlined_call_operand.vmem [shape: f32[16,128], index: 3, kind: output, shape index: {}]  }
   0x1   :  { %v16_v0 = vld [vmem:[%s218_s1] sm:$0xff]  ;;  %v17_v1 = vld [vmem:[%s218_s1 + $0x8] sm:$0xff]  ;;  %v18_v2 = vld [vmem:[%s218_s1 + $0x10] sm:$0xff] }
   0x2   :  { %v155_v3 = vpack.c.bf16 %v17_v1, %v16_v0  ;;  %v19_v4 = vld [vmem:[%s218_s1 + $0x18] sm:$0xff]  ;;  %v14_v5 = vld [vmem:[%s219_s0] sm:$0xff]  ;;  %v15_v7 = vld [vmem:[%s219_s0 + $0x8] sm:$0xff] }
   0x3   :  { %v159_v6 = vpack.c.bf16 %v19_v4, %v18_v2  ;;  %152 = vmatprep.mubr.msk.f32.mxu0 %vm27_vm0, %v14_v5  ;;  %v135_v8 = vld [vmem:[%s220_s2] ss:$0 sm:$0xff] }
   0x4   :  { %156 = vmatprep.subr.bf16.mxu0 %v155_v3 }
   0x5   :  { %158 = vmatpush3.bf16.msra.mxu0 %v155_v3 }
   0x6   :  { %160 = vmatprep.subr.bf16.mxu0 %v159_v6 }
   0x9   :  { %162 = vmatpush3.bf16.msra.mxu0 %v159_v6 }
   0xc   :  { %153 = vmatmul.mubr.msk.f32.vlgmr.msra.gmra.mrb[0].mxu0 %vm27_vm0, %v15_v7 }
  0xdf   :  { %v154_v9 = vpop.f32.mrb[0].mxu0 }
  0xe0   :  { %v100_v10 = vpop.f32.mrb[1].mxu0  ;;  %v106_v12 = vadd.f32 %v154_v9, %v135_v8 }
  0xe1   :  { %v101_v11 = vadd.f32 %v135_v8, %v100_v10 }
  0xe3   :  { %109 = vmax.xlane.f32.xlu0 %v101_v11 }
  0xe7   :  { %111 = vmax.xlane.f32.xlu0 %v106_v12 }
 0x170   :  { %v110_v13 = vpop.xlane.xlu0 %109 }
 0x171   :  { %v113_v14 = vsub.f32 %v101_v11, %v110_v13 }
 0x173   :  { %v115_v15 = vmul.f32 1.442695, %v113_v14 }
 0x174   :  { %v112_v16 = vpop.xlane.xlu0 %111 }
 0x175   :  { %v114_v17 = vsub.f32 %v106_v12, %v112_v16  ;;  %163 = vpow2.f32 %v115_v15 }
 0x177   :  { %v117_v18 = vmul.f32 1.442695, %v114_v17 }
 0x179   :  { %165 = vpow2.f32 %v117_v18 }
 0x17f   :  { %v164_v19 = vpop.eup %163 }
 0x180   :  { %119 = vadd.xlane.f32.xlu1 %v164_v19 }
 0x183   :  { %v166_v20 = vpop.eup %165 }
 0x184   :  { %121 = vadd.xlane.f32.xlu1 %v166_v20 }
 0x20d   :  { %v120_v21 = vpop.xlane.xlu1 %119 }
 0x20e   :  { %167 = vlog2.f32 %v120_v21 }
 0x211   :  { %v122_v22 = vpop.xlane.xlu1 %121 }
 0x212   :  { %169 = vlog2.f32 %v122_v22 }
 0x218   :  { %v168_v23 = vpop.eup %167 }
 0x219   :  { %v124_v24 = vmul.f32 0.6931472, %v168_v23 }
 0x21b   :  { %v127_v25 = vsub.f32 %v113_v14, %v124_v24 }
 0x21c   :  { %v170_v26 = vpop.eup %169 }
 0x21d   :  { %129 = vst [vmem:[%s221_s3] sm:$0xff] %v127_v25  ;;  %v126_v27 = vmul.f32 0.6931472, %v170_v26 }
 0x21f   :  { %v128_v28 = vsub.f32 %v114_v17, %v126_v27 }
 0x221   :  { %130 = vst [vmem:[%s221_s3 + $0x8] sm:$0xff] %v128_v28 }

</bundles_post_ra>
